<compile_context>
chip_gen: v7x
topology: tpu7x:2x2x1
jax: 0.10.0
libtpu: 0.0.40
codegen_flags: <defaults>
</compile_context>

<pallas_src>
import math

import jax
import jax.numpy as jnp
from jax.experimental import pallas as pl
from jax.experimental.pallas import tpu as pltpu


def _round_up(x, m):
    return ((x + m - 1) // m) * m


def _cdiv(a, b):
    return (a + b - 1) // b


def _vmem_limit_bytes():
    # 128 MiB physical on v5e/v6e, 64 MiB on v7x; keep headroom for compiler scratch.
    try:
        cap = int(pltpu.get_tpu_info().vmem_capacity_bytes)
    except Exception:
        cap = 64 * 1024 * 1024
    return min(cap * 3 // 4, 100 * 1024 * 1024)


# ----------------------------------------------------------------------------- fused path

def _make_fused_kernel(kh, kw, dilation, row_stride, tile_len, oc):
    taps = [(di, dj) for di in range(kh) for dj in range(kw)]

    def kernel(w_ref, x_ref, o_ref):
        # w_ref: (1, kh*kw, OC, C)    per-sample mixed filters (compute dtype), resident
        # x_ref: (1, 1, C, band_len)  flattened padded-input row band (compute dtype)
        # o_ref: (1, 1, OC, TH*Wpp)   output row band, flat spatial on lanes
        acc = jnp.zeros((oc, tile_len), jnp.float32)
        for t, (di, dj) in enumerate(taps):
            off = (di * row_stride + dj) * dilation        # static per-tap flat shift
            xs = x_ref[0, 0, :, off:off + tile_len]        # (C, TH*Wpp) contiguous slice
            acc = acc + jnp.dot(w_ref[0, t], xs,
                                preferred_element_type=jnp.float32)
        o_ref[0, 0] = acc.astype(o_ref.dtype)

    return kernel


def _cond_conv2d_fused(x, wmix, *, out_channels, kh, kw, padding, dilation,
                       compute_dtype, out_dtype):
    """stride == 1 path: im2col fused into the kernel (activations read ~1x from HBM)."""
    B, C, H, W = x.shape
    OC = out_channels
    Hout = H + 2 * padding - dilation * (kh - 1)
    Wout = W + 2 * padding - dilation * (kw - 1)
    Wpp = W + 2 * padding                       # flat row stride of the padded input
    KK = kh * kw

    vmem_limit = _vmem_limit_bytes()
    budget = vmem_limit * 6 // 10
    cdt = jnp.dtype(compute_dtype).itemsize
    odt = jnp.dtype(out_dtype).itemsize

    def footprint(th):
        band_len = _round_up((th + (kh - 1) * dilation) * Wpp + (kw - 1) * dilation, 128)
        tile = th * Wpp
        return (2 * C * band_len * cdt          # input band, double buffered
                + 2 * KK * OC * C * cdt         # mixed filters, double buffered
                + 2 * OC * tile * odt           # output tile, double buffered
                + OC * tile * 4)                # f32 accumulator live values

    # Largest row band that fits the VMEM budget (v7x has only 64 MiB).
    th = max(Hout, 1)
    while th > 1 and footprint(th) > budget:
        th = _cdiv(th, 2)
    n_bands = _cdiv(Hout, th)
    # Keep both v7x TensorCores busy when B is tiny, without dropping below 128 lanes.
    if B * n_bands < 2 and Hout >= 2 and _cdiv(Hout, 2) * Wpp >= 128:
        n_bands = 2
    th = _cdiv(Hout, n_bands)
    n_bands = _cdiv(Hout, th)
    hout_pad = th * n_bands
    tile = th * Wpp
    band_len = _round_up((th + (kh - 1) * dilation) * Wpp + (kw - 1) * dilation, 128)

    # Pad spatially once, flatten rows, pad the tail so every band slice (incl. the
    # kw-1 column spill of its last row) stays in bounds. Zero padding -> garbage
    # rows/columns are numerically harmless and sliced off below.
    xp = jnp.pad(x.astype(compute_dtype),
                 ((0, 0), (0, 0), (padding, padding), (padding, padding)))
    xflat = xp.reshape(B, C, (H + 2 * padding) * Wpp)
    flat_need = (n_bands - 1) * th * Wpp + band_len
    if flat_need > xflat.shape[-1]:
        xflat = jnp.pad(xflat, ((0, 0), (0, 0), (0, flat_need - xflat.shape[-1])))
    if n_bands == 1:
        xbands = xflat[:, None, :, :band_len]
    else:
        xbands = jnp.stack(
            [xflat[:, :, tb * th * Wpp: tb * th * Wpp + band_len] for tb in range(n_bands)],
            axis=1)                                        # (B, n_bands, C, band_len)

    kernel = _make_fused_kernel(kh, kw, dilation, Wpp, tile, OC)
    flops = 2 * B * OC * C * KK * hout_pad * Wpp
    bytes_accessed = (xbands.size * cdt + wmix.size * cdt
                      + B * n_bands * OC * tile * odt)

    out = pl.pallas_call(
        kernel,
        out_shape=jax.ShapeDtypeStruct((B, n_bands, OC, tile), out_dtype),
        grid=(B, n_bands),
        in_specs=[
            pl.BlockSpec((1, KK, OC, C), lambda b, t: (b, 0, 0, 0)),       # resident filters
            pl.BlockSpec((1, 1, C, band_len), lambda b, t: (b, t, 0, 0)),  # row band
        ],
        out_specs=pl.BlockSpec((1, 1, OC, tile), lambda b, t: (b, t, 0, 0)),
        compiler_params=pltpu.CompilerParams(
            dimension_semantics=("parallel", "parallel"),
            vmem_limit_bytes=vmem_limit),
        cost_estimate=pl.CostEstimate(flops=int(flops), transcendentals=0,
                                      bytes_accessed=int(bytes_accessed)),
    )(wmix, xbands)

    out = out.reshape(B, n_bands, OC, th, Wpp)
    out = out.transpose(0, 2, 1, 3, 4).reshape(B, OC, hout_pad, Wpp)  # free when n_bands==1
    return out[:, :, :Hout, :Wout]


# --------------------------------------------------------------------- strided fallback

def _im2col_kernel(wmix_ref, patches_ref, out_ref):
    # wmix_ref: (1, OC, CKK); patches_ref: (1, CKK, t_hw); out_ref: (1, OC, t_hw)
    acc = jnp.dot(wmix_ref[0], patches_ref[0], preferred_element_type=jnp.float32)
    out_ref[0] = acc.astype(out_ref.dtype)


def _cond_conv2d_im2col(x, wmix, *, out_channels, kh, kw, stride, padding, dilation,
                        compute_dtype, out_dtype, tile_hw=1024):
    B, C, H, W = x.shape
    OC = out_channels
    Hout = (H + 2 * padding - dilation * (kh - 1) - 1) // stride + 1
    Wout = (W + 2 * padding - dilation * (kw - 1) - 1) // stride + 1
    CKK = C * kh * kw
    HWout = Hout * Wout

    xp = jnp.pad(x.astype(compute_dtype),
                 ((0, 0), (0, 0), (padding, padding), (padding, padding)))
    cols = []
    for di in range(kh):
        for dj in range(kw):
            hs, ws = di * dilation, dj * dilation
            cols.append(xp[:, :,
                           hs:hs + (Hout - 1) * stride + 1:stride,
                           ws:ws + (Wout - 1) * stride + 1:stride])
    patches = jnp.stack(cols, axis=2).reshape(B, CKK, HWout)

    # Balanced lane tiling: minimize zero padding of the flattened spatial dim.
    n_t = max(1, _cdiv(HWout, max(128, tile_hw)))
    t_hw = _round_up(_cdiv(HWout, n_t), 128)
    hw_pad = _round_up(HWout, t_hw)
    if hw_pad != HWout:
        patches = jnp.pad(patches, ((0, 0), (0, 0), (0, hw_pad - HWout)))

    out = pl.pallas_call(
        _im2col_kernel,
        out_shape=jax.ShapeDtypeStruct((B, OC, hw_pad), out_dtype),
        grid=(B, hw_pad // t_hw),
        in_specs=[
            pl.BlockSpec((1, OC, CKK), lambda b, hw: (b, 0, 0)),
            pl.BlockSpec((1, CKK, t_hw), lambda b, hw: (b, 0, hw)),
        ],
        out_specs=pl.BlockSpec((1, OC, t_hw), lambda b, hw: (b, 0, hw)),
        compiler_params=pltpu.CompilerParams(
            dimension_semantics=("parallel", "parallel"),
            vmem_limit_bytes=_vmem_limit_bytes()),
    )(wmix, patches)
    return out[:, :, :HWout].reshape(B, OC, Hout, Wout)


# ------------------------------------------------------------------------------- public

def cond_conv2d(x, routing_weights, expert_weight, *, out_channels,
                kernel_size=3, stride=1, padding=1, dilation=1,
                expert_bias=None, compute_dtype=jnp.bfloat16, out_dtype=None):
    """CondConv2d forward (groups=1, static symmetric padding).

    x:               (B, C, H, W) NCHW, like PyTorch.
    routing_weights: (B, E)
    expert_weight:   (E, OC * C * kh * kw) flattened in (OC, C, kh, kw) order.
    expert_bias:     optional (E, OC) expert bias bank (module default: bias=False).
    compute_dtype:   jnp.bfloat16 (production) or jnp.float32 (verification only, ~3x slower).
    """
    B, C, H, W = x.shape
    kh = kw = kernel_size
    OC = out_channels
    out_dtype = x.dtype if out_dtype is None else out_dtype

    # Hoisted expert mix: one (B,E)@(E,OC*C*kh*kw) XLA MXU matmul -> per-sample filters.
    wmix4 = (routing_weights @ expert_weight).reshape(B, OC, C, kh, kw)

    if stride == 1:
        wmix = wmix4.transpose(0, 3, 4, 1, 2).reshape(B, kh * kw, OC, C).astype(compute_dtype)
        out = _cond_conv2d_fused(x, wmix, out_channels=OC, kh=kh, kw=kw,
                                 padding=padding, dilation=dilation,
                                 compute_dtype=compute_dtype, out_dtype=out_dtype)
    else:
        wmix = wmix4.reshape(B, OC, C * kh * kw).astype(compute_dtype)
        out = _cond_conv2d_im2col(x, wmix, out_channels=OC, kh=kh, kw=kw, stride=stride,
                                  padding=padding, dilation=dilation,
                                  compute_dtype=compute_dtype, out_dtype=out_dtype)

    if expert_bias is not None:
        b_mix = (routing_weights @ expert_bias).astype(out.dtype)   # (B, OC)
        out = out + b_mix[:, :, None, None]
    return out


if __name__ == "__main__":
    B, C, OC, H, W, E, K = 2, 4, 8, 16, 16, 4, 3

    key = jax.random.PRNGKey(0)
    k_x, k_r, k_w = jax.random.split(key, 3)

    x = jax.random.normal(k_x, (B, C, H, W), jnp.float32)
    routing = jax.nn.sigmoid(jax.random.normal(k_r, (B, E), jnp.float32))

    # Deterministic kaiming-uniform-style init of the expert weight bank (E, OC*C*K*K).
    fan_in = C * K * K
    bound = math.sqrt(6.0 / fan_in)
    expert_weight = jax.random.uniform(
        k_w, (E, OC * C * K * K), jnp.float32, minval=-bound, maxval=bound)

    # Reference: mix weights in plain JAX and run per-sample convs.
    mixed_w = (routing @ expert_weight).reshape(B, OC, C, K, K)

    def ref_conv(stride):
        return jnp.concatenate([
            jax.lax.conv_general_dilated(
                x[b:b + 1], mixed_w[b], window_strides=(stride, stride),
                padding=((1, 1), (1, 1)),
                dimension_numbers=("NCHW", "OIHW", "NCHW"))
            for b in range(B)], axis=0)

    # Production path: fused im2col, bf16 MXU operands, f32 accumulation.
    out_bf16 = jax.block_until_ready(
        cond_conv2d(x, routing, expert_weight, out_channels=OC, kernel_size=K))
    # Verification-only f32 path (exact up to f32 rounding).
    out_f32 = jax.block_until_ready(
        cond_conv2d(x, routing, expert_weight, out_channels=OC, kernel_size=K,
                    compute_dtype=jnp.float32))
    # Strided fallback path (XLA im2col feeding the same MXU-style kernel).
    out_s2 = jax.block_until_ready(
        cond_conv2d(x, routing, expert_weight, out_channels=OC, kernel_size=K,
                    stride=2, compute_dtype=jnp.float32))

    ref1 = ref_conv(1)
    ref2 = ref_conv(2)

    assert out_bf16.shape == (B, OC, H, W)
    assert out_f32.shape == (B, OC, H, W)
    assert out_s2.shape == ref2.shape
    assert jnp.allclose(out_f32, ref1, atol=1e-4, rtol=1e-4), \
        f"f32 max abs err = {float(jnp.max(jnp.abs(out_f32 - ref1)))}"
    assert jnp.allclose(out_bf16, ref1, atol=5e-2, rtol=5e-2), \
        f"bf16 max abs err = {float(jnp.max(jnp.abs(out_bf16 - ref1)))}"
    assert jnp.allclose(out_s2, ref2, atol=1e-4, rtol=1e-4), \
        f"stride-2 f32 max abs err = {float(jnp.max(jnp.abs(out_s2 - ref2)))}"
    print("KERNEL_OK")
</pallas_src>

<mosaic_0001>
module attributes {stable_mosaic.version = 11 : i64} {
  func.func @kernel(%arg0: i32, %arg1: i32, %arg2: memref<1x9x8x4xbf16, #tpu.memory_space<vmem>>, %arg3: memref<1x1x4x384xbf16, #tpu.memory_space<vmem>>, %arg4: memref<1x1x8x288xf32, #tpu.memory_space<vmem>>) attributes {dimension_semantics = [#tpu.dimension_semantics<parallel>, #tpu.dimension_semantics<parallel>], iteration_bounds = array<i64: 2, 1>, scalar_prefetch = 0 : i64, scratch_operands = 0 : i64, tpu.core_type = #tpu.core_type<tc>, window_params = [{transform_indices = @transform_0, window_bounds = array<i64: 1, 9, 8, 4>}, {transform_indices = @transform_1, window_bounds = array<i64: 1, 1, 4, 384>}, {transform_indices = @transform_2, window_bounds = array<i64: 1, 1, 8, 288>}]} {
    %cst = arith.constant 0.000000e+00 : f32
    %0 = vector.broadcast %cst : f32 to vector<8x288xf32>
    %c0 = arith.constant 0 : index
    %c0_0 = arith.constant 0 : index
    %c0_1 = arith.constant 0 : index
    %c0_2 = arith.constant 0 : index
    %1 = vector.load %arg3[%c0, %c0_0, %c0_1, %c0_2] : memref<1x1x4x384xbf16, #tpu.memory_space<vmem>>, vector<1x1x4x288xbf16>
    %2 = vector.shape_cast %1 : vector<1x1x4x288xbf16> to vector<4x288xbf16>
    %c0_3 = arith.constant 0 : index
    %c0_4 = arith.constant 0 : index
    %c0_5 = arith.constant 0 : index
    %c0_6 = arith.constant 0 : index
    %3 = vector.load %arg2[%c0_3, %c0_4, %c0_5, %c0_6] : memref<1x9x8x4xbf16, #tpu.memory_space<vmem>>, vector<1x1x8x4xbf16>
    %4 = vector.shape_cast %3 : vector<1x1x8x4xbf16> to vector<8x4xbf16>
    %cst_7 = arith.constant dense<0.000000e+00> : vector<8x288xf32>
    %5 = tpu.matmul %4, %2, %cst_7 {dimension_numbers = #tpu.dot_dimension_numbers<[1], [0], [0], [1], [0, 0, 1, 1], [], []>} : vector<8x4xbf16>, vector<4x288xbf16>, vector<8x288xf32> -> vector<8x288xf32>
    %6 = arith.addf %0, %5 : vector<8x288xf32>
    %c0_8 = arith.constant 0 : index
    %c0_9 = arith.constant 0 : index
    %c0_10 = arith.constant 0 : index
    %c1 = arith.constant 1 : index
    %7 = vector.load %arg3[%c0_8, %c0_9, %c0_10, %c1] : memref<1x1x4x384xbf16, #tpu.memory_space<vmem>>, vector<1x1x4x288xbf16>
    %8 = vector.shape_cast %7 : vector<1x1x4x288xbf16> to vector<4x288xbf16>
    %c0_11 = arith.constant 0 : index
    %c1_12 = arith.constant 1 : index
    %c0_13 = arith.constant 0 : index
    %c0_14 = arith.constant 0 : index
    %9 = vector.load %arg2[%c0_11, %c1_12, %c0_13, %c0_14] : memref<1x9x8x4xbf16, #tpu.memory_space<vmem>>, vector<1x1x8x4xbf16>
    %10 = vector.shape_cast %9 : vector<1x1x8x4xbf16> to vector<8x4xbf16>
    %cst_15 = arith.constant dense<0.000000e+00> : vector<8x288xf32>
    %11 = tpu.matmul %10, %8, %cst_15 {dimension_numbers = #tpu.dot_dimension_numbers<[1], [0], [0], [1], [0, 0, 1, 1], [], []>} : vector<8x4xbf16>, vector<4x288xbf16>, vector<8x288xf32> -> vector<8x288xf32>
    %12 = arith.addf %6, %11 : vector<8x288xf32>
    %c0_16 = arith.constant 0 : index
    %c0_17 = arith.constant 0 : index
    %c0_18 = arith.constant 0 : index
    %c2 = arith.constant 2 : index
    %13 = vector.load %arg3[%c0_16, %c0_17, %c0_18, %c2] : memref<1x1x4x384xbf16, #tpu.memory_space<vmem>>, vector<1x1x4x288xbf16>
    %14 = vector.shape_cast %13 : vector<1x1x4x288xbf16> to vector<4x288xbf16>
    %c0_19 = arith.constant 0 : index
    %c2_20 = arith.constant 2 : index
    %c0_21 = arith.constant 0 : index
    %c0_22 = arith.constant 0 : index
    %15 = vector.load %arg2[%c0_19, %c2_20, %c0_21, %c0_22] : memref<1x9x8x4xbf16, #tpu.memory_space<vmem>>, vector<1x1x8x4xbf16>
    %16 = vector.shape_cast %15 : vector<1x1x8x4xbf16> to vector<8x4xbf16>
    %cst_23 = arith.constant dense<0.000000e+00> : vector<8x288xf32>
    %17 = tpu.matmul %16, %14, %cst_23 {dimension_numbers = #tpu.dot_dimension_numbers<[1], [0], [0], [1], [0, 0, 1, 1], [], []>} : vector<8x4xbf16>, vector<4x288xbf16>, vector<8x288xf32> -> vector<8x288xf32>
    %18 = arith.addf %12, %17 : vector<8x288xf32>
    %c0_24 = arith.constant 0 : index
    %c0_25 = arith.constant 0 : index
    %c0_26 = arith.constant 0 : index
    %c18 = arith.constant 18 : index
    %19 = vector.load %arg3[%c0_24, %c0_25, %c0_26, %c18] : memref<1x1x4x384xbf16, #tpu.memory_space<vmem>>, vector<1x1x4x288xbf16>
    %20 = vector.shape_cast %19 : vector<1x1x4x288xbf16> to vector<4x288xbf16>
    %c0_27 = arith.constant 0 : index
    %c3 = arith.constant 3 : index
    %c0_28 = arith.constant 0 : index
    %c0_29 = arith.constant 0 : index
    %21 = vector.load %arg2[%c0_27, %c3, %c0_28, %c0_29] : memref<1x9x8x4xbf16, #tpu.memory_space<vmem>>, vector<1x1x8x4xbf16>
    %22 = vector.shape_cast %21 : vector<1x1x8x4xbf16> to vector<8x4xbf16>
    %cst_30 = arith.constant dense<0.000000e+00> : vector<8x288xf32>
    %23 = tpu.matmul %22, %20, %cst_30 {dimension_numbers = #tpu.dot_dimension_numbers<[1], [0], [0], [1], [0, 0, 1, 1], [], []>} : vector<8x4xbf16>, vector<4x288xbf16>, vector<8x288xf32> -> vector<8x288xf32>
    %24 = arith.addf %18, %23 : vector<8x288xf32>
    %c0_31 = arith.constant 0 : index
    %c0_32 = arith.constant 0 : index
    %c0_33 = arith.constant 0 : index
    %c19 = arith.constant 19 : index
    %25 = vector.load %arg3[%c0_31, %c0_32, %c0_33, %c19] : memref<1x1x4x384xbf16, #tpu.memory_space<vmem>>, vector<1x1x4x288xbf16>
    %26 = vector.shape_cast %25 : vector<1x1x4x288xbf16> to vector<4x288xbf16>
    %c0_34 = arith.constant 0 : index
    %c4 = arith.constant 4 : index
    %c0_35 = arith.constant 0 : index
    %c0_36 = arith.constant 0 : index
    %27 = vector.load %arg2[%c0_34, %c4, %c0_35, %c0_36] : memref<1x9x8x4xbf16, #tpu.memory_space<vmem>>, vector<1x1x8x4xbf16>
    %28 = vector.shape_cast %27 : vector<1x1x8x4xbf16> to vector<8x4xbf16>
    %cst_37 = arith.constant dense<0.000000e+00> : vector<8x288xf32>
    %29 = tpu.matmul %28, %26, %cst_37 {dimension_numbers = #tpu.dot_dimension_numbers<[1], [0], [0], [1], [0, 0, 1, 1], [], []>} : vector<8x4xbf16>, vector<4x288xbf16>, vector<8x288xf32> -> vector<8x288xf32>
    %30 = arith.addf %24, %29 : vector<8x288xf32>
    %c0_38 = arith.constant 0 : index
    %c0_39 = arith.constant 0 : index
    %c0_40 = arith.constant 0 : index
    %c20 = arith.constant 20 : index
    %31 = vector.load %arg3[%c0_38, %c0_39, %c0_40, %c20] : memref<1x1x4x384xbf16, #tpu.memory_space<vmem>>, vector<1x1x4x288xbf16>
    %32 = vector.shape_cast %31 : vector<1x1x4x288xbf16> to vector<4x288xbf16>
    %c0_41 = arith.constant 0 : index
    %c5 = arith.constant 5 : index
    %c0_42 = arith.constant 0 : index
    %c0_43 = arith.constant 0 : index
    %33 = vector.load %arg2[%c0_41, %c5, %c0_42, %c0_43] : memref<1x9x8x4xbf16, #tpu.memory_space<vmem>>, vector<1x1x8x4xbf16>
    %34 = vector.shape_cast %33 : vector<1x1x8x4xbf16> to vector<8x4xbf16>
    %cst_44 = arith.constant dense<0.000000e+00> : vector<8x288xf32>
    %35 = tpu.matmul %34, %32, %cst_44 {dimension_numbers = #tpu.dot_dimension_numbers<[1], [0], [0], [1], [0, 0, 1, 1], [], []>} : vector<8x4xbf16>, vector<4x288xbf16>, vector<8x288xf32> -> vector<8x288xf32>
    %36 = arith.addf %30, %35 : vector<8x288xf32>
    %c0_45 = arith.constant 0 : index
    %c0_46 = arith.constant 0 : index
    %c0_47 = arith.constant 0 : index
    %c36 = arith.constant 36 : index
    %37 = vector.load %arg3[%c0_45, %c0_46, %c0_47, %c36] : memref<1x1x4x384xbf16, #tpu.memory_space<vmem>>, vector<1x1x4x288xbf16>
    %38 = vector.shape_cast %37 : vector<1x1x4x288xbf16> to vector<4x288xbf16>
    %c0_48 = arith.constant 0 : index
    %c6 = arith.constant 6 : index
    %c0_49 = arith.constant 0 : index
    %c0_50 = arith.constant 0 : index
    %39 = vector.load %arg2[%c0_48, %c6, %c0_49, %c0_50] : memref<1x9x8x4xbf16, #tpu.memory_space<vmem>>, vector<1x1x8x4xbf16>
    %40 = vector.shape_cast %39 : vector<1x1x8x4xbf16> to vector<8x4xbf16>
    %cst_51 = arith.constant dense<0.000000e+00> : vector<8x288xf32>
    %41 = tpu.matmul %40, %38, %cst_51 {dimension_numbers = #tpu.dot_dimension_numbers<[1], [0], [0], [1], [0, 0, 1, 1], [], []>} : vector<8x4xbf16>, vector<4x288xbf16>, vector<8x288xf32> -> vector<8x288xf32>
    %42 = arith.addf %36, %41 : vector<8x288xf32>
    %c0_52 = arith.constant 0 : index
    %c0_53 = arith.constant 0 : index
    %c0_54 = arith.constant 0 : index
    %c37 = arith.constant 37 : index
    %43 = vector.load %arg3[%c0_52, %c0_53, %c0_54, %c37] : memref<1x1x4x384xbf16, #tpu.memory_space<vmem>>, vector<1x1x4x288xbf16>
    %44 = vector.shape_cast %43 : vector<1x1x4x288xbf16> to vector<4x288xbf16>
    %c0_55 = arith.constant 0 : index
    %c7 = arith.constant 7 : index
    %c0_56 = arith.constant 0 : index
    %c0_57 = arith.constant 0 : index
    %45 = vector.load %arg2[%c0_55, %c7, %c0_56, %c0_57] : memref<1x9x8x4xbf16, #tpu.memory_space<vmem>>, vector<1x1x8x4xbf16>
    %46 = vector.shape_cast %45 : vector<1x1x8x4xbf16> to vector<8x4xbf16>
    %cst_58 = arith.constant dense<0.000000e+00> : vector<8x288xf32>
    %47 = tpu.matmul %46, %44, %cst_58 {dimension_numbers = #tpu.dot_dimension_numbers<[1], [0], [0], [1], [0, 0, 1, 1], [], []>} : vector<8x4xbf16>, vector<4x288xbf16>, vector<8x288xf32> -> vector<8x288xf32>
    %48 = arith.addf %42, %47 : vector<8x288xf32>
    %c0_59 = arith.constant 0 : index
    %c0_60 = arith.constant 0 : index
    %c0_61 = arith.constant 0 : index
    %c38 = arith.constant 38 : index
    %49 = vector.load %arg3[%c0_59, %c0_60, %c0_61, %c38] : memref<1x1x4x384xbf16, #tpu.memory_space<vmem>>, vector<1x1x4x288xbf16>
    %50 = vector.shape_cast %49 : vector<1x1x4x288xbf16> to vector<4x288xbf16>
    %c0_62 = arith.constant 0 : index
    %c8 = arith.constant 8 : index
    %c0_63 = arith.constant 0 : index
    %c0_64 = arith.constant 0 : index
    %51 = vector.load %arg2[%c0_62, %c8, %c0_63, %c0_64] : memref<1x9x8x4xbf16, #tpu.memory_space<vmem>>, vector<1x1x8x4xbf16>
    %52 = vector.shape_cast %51 : vector<1x1x8x4xbf16> to vector<8x4xbf16>
    %cst_65 = arith.constant dense<0.000000e+00> : vector<8x288xf32>
    %53 = tpu.matmul %52, %50, %cst_65 {dimension_numbers = #tpu.dot_dimension_numbers<[1], [0], [0], [1], [0, 0, 1, 1], [], []>} : vector<8x4xbf16>, vector<4x288xbf16>, vector<8x288xf32> -> vector<8x288xf32>
    %54 = arith.addf %48, %53 : vector<8x288xf32>
    %c0_66 = arith.constant 0 : index
    %c0_67 = arith.constant 0 : index
    %c0_68 = arith.constant 0 : index
    %c0_69 = arith.constant 0 : index
    %55 = vector.load %arg4[%c0_66, %c0_67, %c0_68, %c0_69] : memref<1x1x8x288xf32, #tpu.memory_space<vmem>>, vector<1x1x8x288xf32>
    %56 = vector.shape_cast %55 : vector<1x1x8x288xf32> to vector<8x288xf32>
    %57 = vector.shape_cast %54 : vector<8x288xf32> to vector<1x1x8x288xf32>
    tpu.vector_store %arg4[%c0_66, %c0_67, %c0_68, %c0_69], %57 {strides = array<i32>} : memref<1x1x8x288xf32, #tpu.memory_space<vmem>>, vector<1x1x8x288xf32>,
    return
  }
  func.func @transform_0(%arg0: i32, %arg1: i32) -> (i32, i32, i32, i32) {
    %c0_i32 = arith.constant 0 : i32
    %c0_i32_0 = arith.constant 0 : i32
    %c0_i32_1 = arith.constant 0 : i32
    %c0_i32_2 = arith.constant 0 : i32
    return %arg0, %c0_i32, %c0_i32_0, %c0_i32_1 : i32, i32, i32, i32
  }
  func.func @transform_1(%arg0: i32, %arg1: i32) -> (i32, i32, i32, i32) {
    %c0_i32 = arith.constant 0 : i32
    %c0_i32_0 = arith.constant 0 : i32
    %c0_i32_1 = arith.constant 0 : i32
    return %arg0, %arg1, %c0_i32, %c0_i32_0 : i32, i32, i32, i32
  }
  func.func @transform_2(%arg0: i32, %arg1: i32) -> (i32, i32, i32, i32) {
    %c0_i32 = arith.constant 0 : i32
    %c0_i32_0 = arith.constant 0 : i32
    %c0_i32_1 = arith.constant 0 : i32
    return %arg0, %arg1, %c0_i32, %c0_i32_0 : i32, i32, i32, i32
  }
}

</mosaic_0001>

<bundles_post_ra>
// kernel: tpu_custom_call.1
= control target key start
LH: loop header
LB: loop body
LE: loop exit
PB: predicated region body
PF: predicated region fallthrough
CT: control target
= control target key end

     0   :  { %7 = vsyncpa [#allocation3], 0  ;;  %s2017_s0 = inlined_call_operand.vmem [shape: bf16[2,9,8,4], index: 0, kind: input, shape index: {}]   ;;  %s2018_s1 = inlined_call_operand.vmem [shape: bf16[2,1,4,384], index: 1, kind: input, shape index: {}]   ;;  %s2019_s2 = inlined_call_operand.hbm [shape: f32[2,1,8,288], index: 2, kind: output, shape index: {}]  }
   0x1   :  { %9 = vsyncpa [#allocation3 + $0x1], 0  ;;  %s1764_s9 = smov 0   ;;  %s1766_s10 = smov 0  }
   0x2   :  { %s1768_s11 = smov 0   ;;  %s1770_s12 = smov 0  }
   0x3   :  { %s1772_s13 = smov 0   ;;  %s1774_s14 = smov 0  }
   0x4 LB: > { %s1396_s15 = sadd.s32 4294967295, %s1734_s14   ;;  %s1397_s16 = sadd.s32 4294967294, %s1734_s14   ;;  %s1734_s14 = sphi %s1774_s14, %s15_s14   ;;  %s1730_s13 = sphi %s1772_s13, %s2026_s13   ;;  %s1726_s12 = sphi %s1770_s12, %s2025_s12   ;;  %s1722_s11 = sphi %s1768_s11, %s2024_s11   ;;  %s1718_s10 = sphi %s1766_s10, %s2023_s10   ;;  %s1714_s9 = sphi %s1764_s9, %s2022_s9  }
   0x5   : > { %s27_s17 = sadd.s32 1, %s1730_s13  ;;  %s90_s18 = sadd.s32 1, %s1722_s11 }
   0x6   : > { %p29_p0 = scmp.ge.s32.totalorder %s27_s17, 2  ;;  %p100_p1 = scmp.ne.s32.totalorder %s1722_s11, %s1718_s10 }
   0x7   : > { %p101_p2 = scmp.eq.s32.totalorder %s1396_s15, 1  ;;  %p106_p3 = scmp.ne.s32.totalorder %s1718_s10, %s1714_s9 }
   0x8   : > { %s2028_s17 = smov (%p29_p0, %s27_s17), 0  ;;  %p107_p5 = scmp.eq.s32.totalorder %s1397_s16, 1 }
   0x9   : > { %p1804_p4 = por %p101_p2, %p100_p1  ;;  %s85_s20 = ssub.s32 %s1730_s13, %s2028_s17 }
   0xa   : > { %p1400_p6 = scmp.ge.s32.totalorder %s1734_s14, 1  ;;  %p88_p7 = scmp.eq.s32.totalorder %s85_s20, 0 }
   0xb   : > { %p1811_p8 = por %p107_p5, %p106_p3  ;;  %p145_p9 = scmp.lt.s32.totalorder %s1734_s14, 3 }
   0xc   : > { %s1817_s22 = scalar_select %p88_p7, %s1722_s11, %s90_s18  }
   0xd   : > { %p146_p10 = pnand %p1400_p6, %p145_p9 }
   0xe   : > { %p176_p11 = scmp.lt.s32.totalorder (!%p146_p10), %s1726_s12, 1  ;;  %v200_v0 = vlaneseq (!%p146_p10)  ;;  %v1736_v1 = vmov (!%p146_p10), 1983009808   ;;  %v1737_v3 = vmov (!%p146_p10), 0.0   ;;  %vm1738_vm0 = vmmov (!%p146_p10), 0   ;;  %s1740_s28 = smov (!%p146_p10), 127  }
   0xf   : > { %149 = sbr.rel (%p146_p10) target bundleno = 478 (0x1de), region = 28  ;;  %v198_v2 = vunpack.c.l.s4 (!%p146_p10), %v1736_v1  ;;  %1459 = vmatprep.subr.bf16.mxu1 (!%p146_p10), %v1737_v3  ;;  %1461 = vmatprep.mubr.msk.bf16.mxu1 (!%p146_p10), %vm1738_vm0, %v1737_v3  ;;  %v1739_v6 = vmov (!%p146_p10), 0   ;;  %s1741_s29 = smov (!%p146_p10), 126   ;;  %vm225_vm1 = vcmask (!%p146_p10), 1041408   ;;  %vm218_vm2 = vcmask (!%p146_p10), 1039360  }
  0x10   : > { %v201_v4 = vshrl.u32 (!%p146_p10), %v200_v0, 7  ;;  %267 = vmatprep.mubr.bf16.mxu0 (!%p146_p10), %v1739_v6  ;;  %s1742_s30 = smov (!%p146_p10), 110   ;;  %s1743_s3 = smov (!%p146_p10), 109   ;;  %vm221_vm3 = vcmask (!%p146_p10), 31744   ;;  %vm435_vm4 = vcmask (!%p146_p10), 1031168   ;;  %vm560_vm5 = vcmask (!%p146_p10), 900096  }
  0x11   : > { %v199_v5 = vunpack.c.0.s8 (!%p146_p10), %v198_v2  ;;  %s1744_s4 = smov (!%p146_p10), 108   ;;  %s1745_s5 = smov (!%p146_p10), 92   ;;  %vm685_vm6 = vcmask (!%p146_p10), 891904   ;;  %vm810_vm7 = vcmask (!%p146_p10), 883712   ;;  %vm935_vm8 = vcmask (!%p146_p10), 752640  }
  0x12   : > { %s1746_s6 = smov (!%p146_p10), 91   ;;  %s1747_s7 = smov (!%p146_p10), 90   ;;  %vm1060_vm9 = vcmask (!%p146_p10), 744448   ;;  %vm1185_vm10 = vcmask (!%p146_p10), 736256   ;;  %vm1286_vm11 = vcmask (!%p146_p10), 261120  }
  0x13   : > { %v1828_v7 = vsub.s32 (!%p146_p10), %v199_v5, %v201_v4  ;;  %s173_s20 = sand.u32 (!%p146_p10), 1, %s1718_s10  }
  0x16   : > { %s1822_s23 = scalar_select %p176_p11, %s1726_s12, 1 }
  0x18   : > { %s1579_s24 = smul.u32 6, %s1822_s23 }
  0x19   : > { %s1578_s8 = smul.u32 36, %s1822_s23 }
  0x1a   : > { %s1833_s27 = scalar_lea.vmem %s2018_s1, %s1579_s24  ;;  %s1577_s23 = smul.u32 24, %s173_s20 }
  0x1b   : > { %v191_v8 = vld [vmem:[%s1833_s27] sm:$0x3f]  ;;  %s1874_s18 = scalar_lea.vmem %s2017_s0, %s1578_s8  ;;  %s1580_s24 = smul.u32 384, %s1726_s12 }
  0x1c   : > { %v1837_v9 = vrot.slane %v191_v8, %v1828_v7  ;;  %v196_v10 = vcombine.high %v191_v8, %v191_v8  ;;  %v409_v11 = vld [vmem:[%s1833_s27] sm:$0x3f]  ;;  %s175_s25 = scalar_lea.vmem [#allocation2], %s1577_s23  ;;  %s1289_s12 = scalar_lea.sflag [#allocation3], %s173_s20 }
  0x1d   : > { %v420_v14 = vrot.slane %v409_v11, %v1828_v7  ;;  %v413_v15 = vcombine.high %v409_v11, %v409_v11  ;;  %v534_v17 = vld [vmem:[%s1833_s27] sm:$0x3f]  ;;  %s1305_s26 = sshll.u32 %s175_s25, 4  ;;  %s1972_s26 = int_to_ptr.vmem [resolvable:$true] %s1305_s26 }
  0x1e   : > { %212 = vrot.lane.b32.xlu0 %v1837_v9, %s1740_s28  ;;  %v1842_v12 = vrot.slane %v196_v10, %v1828_v7  ;;  %v1846_v13 = vcombine.high %v1837_v9, %v1837_v9  ;;  %v545_v19 = vrot.slane %v534_v17, %v1828_v7  ;;  %v538_v20 = vcombine.high %v534_v17, %v534_v17  ;;  %v659_v22 = vld [vmem:[%s1833_s27] sm:$0x3f]  ;;  %v1414_v17 = vld [vmem:[%s1874_s18 + $0xc] sm:$0xf] }
  0x1f   : > { %v428_v16 = vcombine.high %v420_v14, %v420_v14  ;;  %v427_v18 = vrot.slane %v413_v15, %v1828_v7  ;;  %v670_v24 = vrot.slane %v659_v22, %v1828_v7  ;;  %v663_v25 = vcombine.high %v659_v22, %v659_v22  ;;  %v784_v27 = vld [vmem:[%s1833_s27] sm:$0x3f] }
  0x20   : > { %216 = vrot.lane.b32.xlu1 %v1842_v12, %s1740_s28  ;;  %v553_v21 = vcombine.high %v545_v19, %v545_v19  ;;  %v552_v23 = vrot.slane %v538_v20, %v1828_v7  ;;  %v795_v29 = vrot.slane %v784_v27, %v1828_v7  ;;  %v788_v30 = vcombine.high %v784_v27, %v784_v27  ;;  %v909_v32 = vld [vmem:[%s1833_s27] sm:$0x3f] }
  0x21   : > { %v678_v26 = vcombine.high %v670_v24, %v670_v24  ;;  %v677_v28 = vrot.slane %v663_v25, %v1828_v7  ;;  %v920_v34 = vrot.slane %v909_v32, %v1828_v7  ;;  %v913_v35 = vcombine.high %v909_v32, %v909_v32  ;;  %v1034_v37 = vld [vmem:[%s1833_s27] sm:$0x3f]  ;;  %v1418_v25 = vld [vmem:[%s1874_s18 + $0x10] sm:$0xf] }
  0x22   : > { %214 = vrot.lane.b32.xlu0 %v1846_v13, %s1740_s28  ;;  %v803_v31 = vcombine.high %v795_v29, %v795_v29  ;;  %v802_v33 = vrot.slane %v788_v30, %v1828_v7  ;;  %v1045_v39 = vrot.slane %v1034_v37, %v1828_v7  ;;  %v1038_v40 = vcombine.high %v1034_v37, %v1034_v37  ;;  %v1159_v42 = vld [vmem:[%s1833_s27] sm:$0x3f] }
  0x23   : > { %v928_v36 = vcombine.high %v920_v34, %v920_v34  ;;  %v927_v38 = vrot.slane %v913_v35, %v1828_v7  ;;  %v1170_v44 = vrot.slane %v1159_v42, %v1828_v7  ;;  %v1163_v45 = vcombine.high %v1159_v42, %v1159_v42  ;;  %v1403_v52 = vld [vmem:[%s1874_s18 + $0x4] sm:$0xf]  ;;  %v192_v63 = vld [vmem:[%s1874_s18] sm:$0xf] }
  0x24   : > { %429 = vrot.lane.b32.xlu1 %v420_v14, %s1741_s29  ;;  %v1053_v41 = vcombine.high %v1045_v39, %v1045_v39  ;;  %v1052_v43 = vrot.slane %v1038_v40, %v1828_v7  ;;  %v326_v55 = vsel %vm225_vm1, %v1842_v12, 0  ;;  %v320_v58 = vsel %vm225_vm1, %v1837_v9, 0  ;;  %v1410_v9 = vld [vmem:[%s1874_s18 + $0x8] sm:$0xf] }
  0x25   : > { %v1178_v46 = vcombine.high %v1170_v44, %v1170_v44  ;;  %v1177_v47 = vrot.slane %v1163_v45, %v1828_v7 }
  0x26   : > { %431 = vrot.lane.b32.xlu0 %v428_v16, %s1741_s29 }
  0x28   : > { %433 = vrot.lane.b32.xlu1 %v427_v18, %s1741_s29  ;;  %s1970_s29 = scalar_lea.hbm %s2019_s2, %s1580_s24 }
  0x2a   : > { %554 = vrot.lane.b32.xlu0 %v545_v19, %s1742_s30 }
  0x2c   : > { %556 = vrot.lane.b32.xlu1 %v553_v21, %s1742_s30 }
  0x2e   : > { %558 = vrot.lane.b32.xlu0 %v552_v23, %s1742_s30  ;;  %s1656_s30 = scalar_lea.vmem %s1972_s26, 384 }
  0x2f   : > { %p1657_p12 = scmp.ne.s32.totalorder %s1972_s26, %s1656_s30 }
  0x30   : > { %679 = vrot.lane.b32.xlu1 %v670_v24, %s1743_s3 }
  0x31   : > { %p1658_p13 = pnand %p1657_p12, %p1804_p4 }
  0x32   : > { %681 = vrot.lane.b32.xlu0 %v678_v26, %s1743_s3 }
  0x33   : > { %p1659_p0 = pneg %p1658_p13 }
  0x34   : > { %683 = vrot.lane.b32.xlu1 %v677_v28, %s1743_s3  ;;  %s1748_s3 = smov [#allocation2]  }
  0x36   : > { %804 = vrot.lane.b32.xlu0 %v795_v29, %s1744_s4 }
  0x38   : > { %806 = vrot.lane.b32.xlu1 %v803_v31, %s1744_s4 }
  0x3a   : > { %808 = vrot.lane.b32.xlu0 %v802_v33, %s1744_s4  ;;  %v1422_v33 = vld [vmem:[%s1874_s18 + $0x14] sm:$0xf]  ;;  %s1660_s4 = sshll.u32 %s1748_s3, 4  ;;  %s1661_s4 = int_to_ptr.vmem [resolvable:$false] %s1660_s4 }
  0x3b   : > { %p1663_p1 = scmp.lt.s32.totalorder %s1972_s26, %s1661_s4 }
  0x3c   : > { %929 = vrot.lane.b32.xlu1 %v920_v34, %s1745_s5 }
  0x3e   : > { %931 = vrot.lane.b32.xlu0 %v928_v36, %s1745_s5 }
  0x40   : > { %933 = vrot.lane.b32.xlu1 %v927_v38, %s1745_s5  ;;  %s1662_s5 = scalar_lea.vmem %s1661_s4, 768 }
  0x41   : > { %p1664_p2 = scmp.lt.s32.totalorder %s1662_s5, %s1656_s30 }
  0x42   : > { %1054 = vrot.lane.b32.xlu0 %v1045_v39, %s1746_s6 }
  0x43   : > { %p1665_p3 = por %p1664_p2, %p1663_p1 }
  0x44   : > { %1056 = vrot.lane.b32.xlu1 %v1053_v41, %s1746_s6  ;;  %v1426_v41 = vld [vmem:[%s1874_s18 + $0x18] sm:$0xf] }
  0x45   : > { %p1666_p5 = pnand %p1665_p3, %p1659_p0 }
  0x46   : > { %1058 = vrot.lane.b32.xlu0 %v1052_v43, %s1746_s6 }
  0x48   : > { %1179 = vrot.lane.b32.xlu1 %v1170_v44, %s1747_s7 }
  0x4a   : > { %1181 = vrot.lane.b32.xlu0 %v1178_v46, %s1747_s7 }
  0x4c   : > { %1183 = vrot.lane.b32.xlu1 %v1177_v47, %s1747_s7 }
  0x90   : > { %v213_v48 = vpop.permute.xlu0 %212 }
  0x92   : > { %v217_v49 = vpop.permute.xlu1 %216 }
  0x93   : > { %v233_v50 = vsel %vm225_vm1, %v217_v49, 0 }
  0x94   : > { %v215_v51 = vpop.permute.xlu0 %214  ;;  %1460 = vmatpush3.bf16.msra.mxu1 %v233_v50 }
  0x95   : > { %v220_v53 = vsel %vm218_vm2, %v215_v51, %v217_v49  ;;  %v219_v54 = vsel %vm218_vm2, %v213_v48, %v215_v51  ;;  %1465 = vmatprep.subr.bf16.mxu1 %v1737_v3  ;;  %v1430_v48 = vld [vmem:[%s1874_s18 + $0x1c] sm:$0xf] }
  0x96   : > { %1404 = vmatprep.subr.msk.bf16.mxu0 %vm225_vm1, %v220_v53  ;;  %v227_v56 = vsel %vm225_vm1, %v219_v54, 0  ;;  %v430_v57 = vpop.permute.xlu1 %429 }
  0x97   : > { %236 = vmatpush1.bf16.msra.mxu0 %v227_v56  ;;  %1462 = vmatmul.mubr.msk.bf16.vlgmr.msra.gmra.mrb[0].mxu1 %vm221_vm3, %v1403_v52 }
  0x98   : > { %1407 = vmatprep.subr.msk.bf16.mxu0 %vm225_vm1, %v1846_v13  ;;  %1466 = vmatpush3.bf16.msra.mxu1 %v326_v55  ;;  %v432_v59 = vpop.permute.xlu0 %431 }
  0x99   : > { %1467 = vmatprep.mubr.msk.bf16.mxu1 %vm1738_vm0, %v1737_v3  ;;  %1471 = vmatprep.subr.bf16.mxu1 %v1737_v3  ;;  %v436_v0 = vsel %vm435_vm4, %v430_v57, %v432_v59 }
  0x9a   : > { %1405 = vmatmul.mubr.msk.bf16.vlgmr.msra.gmra.mrb[0].mxu0 %vm221_vm3, %v1403_v52  ;;  %v434_v60 = vpop.permute.xlu1 %433  ;;  %v442_v5 = vsel %vm225_vm1, %v436_v0, 0  ;;  %v1434_v52 = vld [vmem:[%s1874_s18 + $0x20] sm:$0xf] }
  0x9b   : > { %329 = vmatpush1.bf16.msra.mxu0 %v320_v58  ;;  %v437_v61 = vsel %vm435_vm4, %v432_v59, %v434_v60  ;;  %360 = vmatprep.mubr.bf16.mxu0 %v1739_v6  ;;  %v448_v1 = vsel %vm225_vm1, %v434_v60, 0 }
  0x9c   : > { %1411 = vmatprep.subr.msk.bf16.mxu0 %vm225_vm1, %v437_v61  ;;  %v555_v62 = vpop.permute.xlu0 %554 }
  0x9e   : > { %v557_v2 = vpop.permute.xlu1 %556 }
  0x9f   : > { %v561_v10 = vsel %vm560_vm5, %v555_v62, %v557_v2 }
  0xa0   : > { %v559_v4 = vpop.permute.xlu0 %558  ;;  %v567_v14 = vsel %vm225_vm1, %v561_v10, 0 }
  0xa1   : > { %v562_v7 = vsel %vm560_vm5, %v557_v2, %v559_v4  ;;  %v573_v11 = vsel %vm225_vm1, %v559_v4, 0 }
  0xa2   : > { %v680_v8 = vpop.permute.xlu1 %679 }
  0xa3   : > { %1468 = vmatmul.mubr.msk.bf16.vlgmr.msra.gmra.mrb[0].mxu1 %vm221_vm3, %v192_v63 }
  0xa4   : > { %1472 = vmatpush3.bf16.msra.mxu1 %v448_v1  ;;  %1473 = vmatprep.mubr.msk.bf16.mxu1 %vm1738_vm0, %v1737_v3  ;;  %v682_v12 = vpop.permute.xlu0 %681 }
  0xa5   : > { %1477 = vmatprep.subr.bf16.mxu1 %v1737_v3  ;;  %v686_v18 = vsel %vm685_vm6, %v680_v8, %v682_v12 }
  0xa6   : > { %1408 = vmatmul.mubr.msk.bf16.vlgmr.msra.gmra.mrb[0].mxu0 %vm221_vm3, %v192_v63  ;;  %v684_v13 = vpop.permute.xlu1 %683  ;;  %v692_v22 = vsel %vm225_vm1, %v686_v18, 0 }
  0xa7   : > { %451 = vmatpush1.bf16.msra.mxu0 %v442_v5  ;;  %482 = vmatprep.mubr.bf16.mxu0 %v1739_v6  ;;  %v687_v15 = vsel %vm685_vm6, %v682_v12, %v684_v13  ;;  %v698_v19 = vsel %vm225_vm1, %v684_v13, 0 }
  0xa8   : > { %1415 = vmatprep.subr.msk.bf16.mxu0 %vm225_vm1, %v562_v7  ;;  %v805_v16 = vpop.permute.xlu0 %804 }
  0xaa   : > { %v807_v20 = vpop.permute.xlu1 %806 }
  0xab   : > { %v811_v26 = vsel %vm810_vm7, %v805_v16, %v807_v20 }
  0xac   : > { %v809_v21 = vpop.permute.xlu0 %808  ;;  %v817_v30 = vsel %vm225_vm1, %v811_v26, 0 }
  0xad   : > { %v812_v23 = vsel %vm810_vm7, %v807_v20, %v809_v21  ;;  %v823_v27 = vsel %vm225_vm1, %v809_v21, 0 }
  0xae   : > { %v930_v24 = vpop.permute.xlu1 %929 }
  0xaf   : > { %1474 = vmatmul.mubr.msk.bf16.vlgmr.msra.gmra.mrb[0].mxu1 %vm221_vm3, %v1410_v9 }
  0xb0   : > { %1478 = vmatpush3.bf16.msra.mxu1 %v573_v11  ;;  %1479 = vmatprep.mubr.msk.bf16.mxu1 %vm1738_vm0, %v1737_v3  ;;  %v932_v28 = vpop.permute.xlu0 %931 }
  0xb1   : > { %1483 = vmatprep.subr.bf16.mxu1 %v1737_v3  ;;  %v936_v34 = vsel %vm935_vm8, %v930_v24, %v932_v28 }
  0xb2   : > { %1412 = vmatmul.mubr.msk.bf16.vlgmr.msra.gmra.mrb[0].mxu0 %vm221_vm3, %v1410_v9  ;;  %v934_v29 = vpop.permute.xlu1 %933  ;;  %v942_v38 = vsel %vm225_vm1, %v936_v34, 0 }
  0xb3   : > { %576 = vmatpush1.bf16.msra.mxu0 %v567_v14  ;;  %607 = vmatprep.mubr.bf16.mxu0 %v1739_v6  ;;  %v937_v31 = vsel %vm935_vm8, %v932_v28, %v934_v29  ;;  %v948_v35 = vsel %vm225_vm1, %v934_v29, 0 }
  0xb4   : > { %1419 = vmatprep.subr.msk.bf16.mxu0 %vm225_vm1, %v687_v15  ;;  %v1055_v32 = vpop.permute.xlu0 %1054 }
  0xb6   : > { %v1057_v36 = vpop.permute.xlu1 %1056 }
  0xb7   : > { %v1061_v42 = vsel %vm1060_vm9, %v1055_v32, %v1057_v36 }
  0xb8   : > { %v1059_v37 = vpop.permute.xlu0 %1058  ;;  %v1067_v46 = vsel %vm225_vm1, %v1061_v42, 0 }
  0xb9   : > { %v1062_v39 = vsel %vm1060_vm9, %v1057_v36, %v1059_v37  ;;  %v1073_v43 = vsel %vm225_vm1, %v1059_v37, 0 }
  0xba   : > { %v1180_v40 = vpop.permute.xlu1 %1179 }
  0xbb   : > { %1480 = vmatmul.mubr.msk.bf16.vlgmr.msra.gmra.mrb[0].mxu1 %vm221_vm3, %v1414_v17 }
  0xbc   : > { %1484 = vmatpush3.bf16.msra.mxu1 %v698_v19  ;;  %1485 = vmatprep.mubr.msk.bf16.mxu1 %vm1738_vm0, %v1737_v3  ;;  %v1182_v44 = vpop.permute.xlu0 %1181 }
  0xbd   : > { %1489 = vmatprep.subr.bf16.mxu1 %v1737_v3  ;;  %v1186_v49 = vsel %vm1185_vm10, %v1180_v40, %v1182_v44 }
  0xbe   : > { %1416 = vmatmul.mubr.msk.bf16.vlgmr.msra.gmra.mrb[0].mxu0 %vm221_vm3, %v1414_v17  ;;  %v1184_v45 = vpop.permute.xlu1 %1183  ;;  %v1192_v51 = vsel %vm225_vm1, %v1186_v49, 0 }
  0xbf   : > { %701 = vmatpush1.bf16.msra.mxu0 %v692_v22  ;;  %732 = vmatprep.mubr.bf16.mxu0 %v1739_v6  ;;  %v1187_v47 = vsel %vm1185_vm10, %v1182_v44, %v1184_v45  ;;  %v1198_v50 = vsel %vm225_vm1, %v1184_v45, 0 }
  0xc0   : > { %1423 = vmatprep.subr.msk.bf16.mxu0 %vm225_vm1, %v812_v23 }
  0xc7   : > { %1486 = vmatmul.mubr.msk.bf16.vlgmr.msra.gmra.mrb[0].mxu1 %vm221_vm3, %v1418_v25 }
  0xc8   : > { %1490 = vmatpush3.bf16.msra.mxu1 %v823_v27  ;;  %1491 = vmatprep.mubr.msk.bf16.mxu1 %vm1738_vm0, %v1737_v3 }
  0xc9   : > { %1495 = vmatprep.subr.bf16.mxu1 %v1737_v3 }
  0xca   : > { %1420 = vmatmul.mubr.msk.bf16.vlgmr.msra.gmra.mrb[0].mxu0 %vm221_vm3, %v1418_v25 }
  0xcb   : > { %826 = vmatpush1.bf16.msra.mxu0 %v817_v30  ;;  %857 = vmatprep.mubr.bf16.mxu0 %v1739_v6 }
  0xcc   : > { %1427 = vmatprep.subr.msk.bf16.mxu0 %vm225_vm1, %v937_v31 }
  0xd3   : > { %1492 = vmatmul.mubr.msk.bf16.vlgmr.msra.gmra.mrb[0].mxu1 %vm221_vm3, %v1422_v33 }
  0xd4   : > { %1496 = vmatpush3.bf16.msra.mxu1 %v948_v35  ;;  %1497 = vmatprep.mubr.msk.bf16.mxu1 %vm1738_vm0, %v1737_v3 }
  0xd5   : > { %1501 = vmatprep.subr.bf16.mxu1 %v1737_v3 }
  0xd6   : > { %1424 = vmatmul.mubr.msk.bf16.vlgmr.msra.gmra.mrb[0].mxu0 %vm221_vm3, %v1422_v33 }
  0xd7   : > { %951 = vmatpush1.bf16.msra.mxu0 %v942_v38  ;;  %982 = vmatprep.mubr.bf16.mxu0 %v1739_v6 }
  0xd8   : > { %1431 = vmatprep.subr.msk.bf16.mxu0 %vm225_vm1, %v1062_v39 }
  0xdf   : > { %1498 = vmatmul.mubr.msk.bf16.vlgmr.msra.gmra.mrb[0].mxu1 %vm221_vm3, %v1426_v41 }
  0xe0   : > { %1502 = vmatpush3.bf16.msra.mxu1 %v1073_v43  ;;  %1503 = vmatprep.mubr.msk.bf16.mxu1 %vm1738_vm0, %v1737_v3 }
  0xe1   : > { %1507 = vmatprep.subr.bf16.mxu1 %v1737_v3 }
  0xe2   : > { %1428 = vmatmul.mubr.msk.bf16.vlgmr.msra.gmra.mrb[0].mxu0 %vm221_vm3, %v1426_v41 }
  0xe3   : > { %1076 = vmatpush1.bf16.msra.mxu0 %v1067_v46  ;;  %1107 = vmatprep.mubr.bf16.mxu0 %v1739_v6 }
  0xe4   : > { %1435 = vmatprep.subr.msk.bf16.mxu0 %vm225_vm1, %v1187_v47 }
  0xeb   : > { %1504 = vmatmul.mubr.msk.bf16.vlgmr.msra.gmra.mrb[0].mxu1 %vm221_vm3, %v1430_v48 }
  0xec   : > { %1508 = vmatpush3.bf16.msra.mxu1 %v1198_v50  ;;  %1509 = vmatprep.mubr.msk.bf16.mxu1 %vm1738_vm0, %v1737_v3 }
  0xee   : > { %1432 = vmatmul.mubr.msk.bf16.vlgmr.msra.gmra.mrb[0].mxu0 %vm221_vm3, %v1430_v48 }
  0xef   : > { %1201 = vmatpush1.bf16.msra.mxu0 %v1192_v51  ;;  %1232 = vmatprep.mubr.bf16.mxu0 %v1739_v6 }
  0xf7   : > { %1510 = vmatmul.mubr.msk.bf16.vlgmr.msra.gmra.mrb[0].mxu1 %vm221_vm3, %v1434_v52 }
  0xfa   : > { %1436 = vmatmul.mubr.msk.bf16.vlgmr.msra.gmra.mrb[0].mxu0 %vm221_vm3, %v1434_v52 }
 0x1ca   : > { %v1275_v53 = vpop.f32.mrb[0].mxu1 }
 0x1cb   : > { %1287 = vst.msk [vmem:[%s175_s25 + $0x10] sm:$0xff] %vm1286_vm11, %v1275_v53  ;;  %v1511_v3 = vpop.f32.mrb[1].mxu1 }
 0x1cc   : > { %v1278_v54 = vpop.f32.mrb[2].mxu1 }
 0x1cd   : > { %v1234_v55 = vpop.f32.mrb[0].mxu0  ;;  %v1512_v56 = vpop.f32.mrb[3].mxu1 }
 0x1ce   : > { %1284 = vst [vmem:[%s175_s25] sm:$0xff] %v1234_v55  ;;  %v1236_v6 = vpop.f32.mrb[1].mxu0 }
 0x1cf   : > { %1285 = vst [vmem:[%s175_s25 + $0x8] sm:$0xff] %v1236_v6  ;;  %v1238_v57 = vpop.f32.mrb[2].mxu0 }
 0x1d0   : > { %v1239_v58 = vpop.f32.mrb[3].mxu0 }
 0x1d1   : > { %1669 = shalt.err (!%p1666_p5)
}
 0x1d2   : > { %s1670_s6 = scalar_lea.hbm %s1970_s29, 384  ;;  %s1674_s15 = scalar_lea.hbm %s2019_s2, 768 }
 0x1d3   : > { %p1671_p6 = scmp.ne.s32.totalorder %s1970_s29, %s1670_s6  ;;  %p1675_p10 = scmp.lt.u32.totalorder %s1970_s29, %s2019_s2 }
 0x1d4   : > { %p1676_p11 = scmp.lt.u32.totalorder %s1674_s15, %s1670_s6  ;;  %p1678_p13 = scmp.lt.u32.totalorder %s1670_s6, %s1970_s29 }
 0x1d5   : > { %p1672_p7 = pnand %p1671_p6, %p1804_p4 }
 0x1d6   : > { %p1677_p12 = por %p1676_p11, %p1675_p10 }
 0x1d7   : > { %p1673_p9 = pneg %p1672_p7 }
 0x1d8   : > { %p1679_p0 = por %p1678_p13, %p1677_p12 }
 0x1da   : > { %p1680_p1 = pnand %p1679_p0, %p1673_p9 }
 0x1dc   : > { %1683 = shalt.err (!%p1680_p1)
}
 0x1dd   : > { %1581 = dma.vmem_to_hbm [thread:$0]  (%p1804_p4), %s1972_s26, 384, %s1970_s29, %s1289_s12  }
 0x1de PF: > { %p1587_p2 = scmp.ge.s32.totalorder %s1734_s14, 2  ;;  %s1317_s20 = sand.u32 1, %s1714_s9  }
 0x1df   : > { %s1318_s23 = scalar_lea.sflag [#allocation3], %s1317_s20 }
 0x1e0   : > { %p1584_p3 = pnand %p1587_p2, %p1811_p8 }
 0x1e2   : > { %1709 = dma.done.wait (!%p1584_p3), %s1318_s23, 384  }
 0x1e3   : > { %1711 = vsyncadd (!%p1584_p3), %s1318_s23, 4294966912  ;;  %s15_s14 = sadd.s32 1, %s1734_s14   ;;  %s2022_s9 = smov %s1718_s10 }
 0x1e4   : > { %p12_p5 = scmp.ge.s32.totalorder %s15_s14, 4   ;;  %s2023_s10 = smov %s1722_s11 }
 0x1e5   : > { %s2024_s11 = smov %s1817_s22  ;;  %s2025_s12 = smov %s1730_s13 }
 0x1e6   : > { %s2026_s13 = smov %s2028_s17  ;;  %14 = sbr.rel (!%p12_p5) target bundleno = 4 (0x4), region = 74 }
 0x1ed   :  { %1323 = vsyncpa [#allocation3], 1 }
 0x1ee   :  { %1325 = vsyncpa [#allocation3 + $0x1], 1 }

</bundles_post_ra>
